<compile_context>
chip_gen: v7x
topology: tpu7x:2x2x1
jax: 0.10.0
libtpu: 0.0.40
codegen_flags: <defaults>
</compile_context>

<pallas_src>
import functools

import jax
import jax.numpy as jnp
from jax.experimental import pallas as pl
from jax.experimental.pallas import tpu as pltpu


# --------------------------------------------------------------------------
# In-kernel helpers
# --------------------------------------------------------------------------
def _mm(w, a, cdt):
    """MXU matmul with f32 accumulation; operands cast to cdt (f32 or bf16)."""
    return jnp.dot(w.astype(cdt), a.astype(cdt),
                   preferred_element_type=jnp.float32)


def _dw3_lanes(y, w0, w1, w2, first, last):
    """Depthwise 3-tap conv (stride 1, pad 1) along the folded lane axis.

    `first`/`last` are hoisted (1, lanes) boundary masks (also prevent leakage
    between batch elements folded into the lane axis).  Lane rotations run on
    the XLU slot.
    """
    b = y.shape[1]
    left = jnp.where(first, 0.0, pltpu.roll(y, shift=1, axis=1))        # y[t-1]
    right = jnp.where(last, 0.0, pltpu.roll(y, shift=b - 1, axis=1))    # y[t+1]
    return w0 * left + w1 * y + w2 * right


def _dw3_stride2(ze, zo, w0, w1, w2, first):
    """Depthwise 3-tap conv, stride 2, pad 1, on pre-split even/odd phases.

    out[t] = w0*z[2t-1] + w1*z[2t] + w2*z[2t+1]
           = w0*zo[t-1] + w1*ze[t] + w2*zo[t]      (zo[-1] == 0 padding)
    Everything stays at the (half-length) output resolution.
    """
    zo_prev = jnp.where(first, 0.0, pltpu.roll(zo, shift=1, axis=1))
    return w0 * zo_prev + w1 * ze + w2 * zo


# --------------------------------------------------------------------------
# Fused kernels (one per ShuffleUnit variant)
# --------------------------------------------------------------------------
def _shuffle_s1_kernel(seq_len, mid,
                       x_ref,
                       p_ref, w1_ref, s1_ref, b1_ref,
                       wd0_ref, wd1_ref, wd2_ref, s2_ref, b2_ref,
                       w2i_ref, s3i_ref, b3i_ref,
                       o_ref):
    """stride == 1 unit: passthrough half + branch2; output pre-shuffled."""
    cdt = jnp.bfloat16 if o_ref.dtype == jnp.bfloat16 else jnp.float32
    lanes = x_ref.shape[1]
    # Hoisted (1, lanes) boundary masks, shared by the depthwise conv.
    pos = jax.lax.broadcasted_iota(jnp.int32, (1, lanes), 1) % seq_len
    first = pos == 0
    last = pos == seq_len - 1

    x1 = x_ref[:mid, :]                              # passthrough half, no cast

    # branch2: 1x1 -> BN -> ReLU -> dw3 -> BN -> 1x1(row-interleaved) -> BN -> ReLU
    y = _mm(w1_ref[...], x_ref[mid:, :], cdt)
    y = jnp.maximum(y * s1_ref[...] + b1_ref[...], 0.0)
    y = _dw3_lanes(y, wd0_ref[...], wd1_ref[...], wd2_ref[...], first, last)
    y = y * s2_ref[...] + b2_ref[...]
    z = _mm(w2i_ref[...], y, cdt)                    # odd rows; even rows == 0
    z = jnp.maximum(z * s3i_ref[...] + b3i_ref[...], 0.0)

    # Passthrough lands on the even output rows via an interleaved 0/1
    # permutation matmul (exact).  The sum is already in
    # channel_shuffle(groups=2) order -> single unmasked lane-dense store.
    o_ref[...] = (_mm(p_ref[...], x1, cdt) + z).astype(o_ref.dtype)


def _shuffle_s2_kernel(half_len,
                       xe_ref, xo_ref,
                       b1d0_ref, b1d1_ref, b1d2_ref, b1s1_ref, b1b1_ref,
                       b2w1_ref, b2s1_ref, b2b1_ref,
                       b2d0_ref, b2d1_ref, b2d2_ref, b2s2_ref, b2b2_ref,
                       w1i_ref, w2i_ref, si_ref, bi_ref,
                       o_ref):
    """stride == 2 unit: both branches fused; output pre-shuffled."""
    cdt = jnp.bfloat16 if o_ref.dtype == jnp.bfloat16 else jnp.float32
    lanes = xe_ref.shape[1]
    pos = jax.lax.broadcasted_iota(jnp.int32, (1, lanes), 1) % half_len
    first = pos == 0                                 # hoisted; shared by both dw

    xe = xe_ref[...].astype(jnp.float32)             # x[:, :, 0::2]  (C_in, Bh)
    xo = xo_ref[...].astype(jnp.float32)             # x[:, :, 1::2]  (C_in, Bh)

    # branch1: dw3(stride 2) -> BN -> [final 1x1 -> BN -> ReLU fused below]
    u = _dw3_stride2(xe, xo, b1d0_ref[...], b1d1_ref[...], b1d2_ref[...], first)
    u = u * b1s1_ref[...] + b1b1_ref[...]

    # branch2: 1x1 -> BN -> ReLU (per phase) -> dw3(stride 2) -> BN -> [1x1 ...]
    ze = jnp.maximum(_mm(b2w1_ref[...], xe, cdt) * b2s1_ref[...] + b2b1_ref[...], 0.0)
    zo = jnp.maximum(_mm(b2w1_ref[...], xo, cdt) * b2s1_ref[...] + b2b1_ref[...], 0.0)
    v = _dw3_stride2(ze, zo, b2d0_ref[...], b2d1_ref[...], b2d2_ref[...], first)
    v = v * b2s2_ref[...] + b2b2_ref[...]

    # Final 1x1 convs of both branches with row-interleaved (zero-padded)
    # weights: the matmul sum directly emits channel_shuffle(groups=2) order.
    m = _mm(w1i_ref[...], u, cdt) + _mm(w2i_ref[...], v, cdt)
    o_ref[...] = jnp.maximum(m * si_ref[...] + bi_ref[...], 0.0).astype(o_ref.dtype)


# --------------------------------------------------------------------------
# pallas_call wrappers
# --------------------------------------------------------------------------
_VMEM_LIMIT = 32 * 1024 * 1024         # safe on v5e/v6e/v7x; raises v5e default


def _full_spec(a):
    nd = a.ndim
    return pl.BlockSpec(a.shape, lambda i, _nd=nd: (0,) * _nd)


def _pick_batch_block(n, lane_unit, bytes_per_lane,
                      vmem_budget_bytes=14 * 1024 * 1024):
    """Pick #batch elements per grid step.

    Chooses the largest divisor of n whose block (a) is lane-dense
    ((bb*lane_unit) % 128 == 0, or spans the full folded axis) and (b) keeps
    the estimated double-buffered working set under the VMEM byte budget.
    Prefers >= 2 grid steps (v7x has 2 TensorCores) when that stays >=512 lanes.
    """
    divisors = [d for d in range(1, n + 1) if n % d == 0]
    legal = [d for d in divisors if d == n or (d * lane_unit) % 128 == 0]
    fits = [d for d in legal
            if d * lane_unit * bytes_per_lane <= vmem_budget_bytes]
    cands = fits if fits else [min(legal)]
    bb = max(cands)
    if n // bb < 2:
        for d in sorted(cands, reverse=True):
            if n // d >= 2 and d * lane_unit >= 512:
                bb = d
                break
    return bb


def _interleave_rows(w_even, w_odd):
    """Row-interleave two (cb, k) matrices -> (2*cb, k): even rows from w_even."""
    return jnp.stack([w_even, w_odd], axis=1).reshape(-1, w_even.shape[1])


def _interleave_cols(a_even, a_odd):
    """Interleave two (cb, 1) column vectors -> (2*cb, 1)."""
    return jnp.stack([a_even, a_odd], axis=1).reshape(-1, 1)


def _shuffle_unit_cm_impl(x_cm, params, stride):
    """Channel-major ShuffleUnit forward.

    x_cm: (C_in, N, L) channel-major.  Returns (C_out, N, L_out) channel-major,
    already channel_shuffle(groups=2)-ordered.  No layout transposes.
    """
    c_in, n, l = x_cm.shape
    cb = params["b2_w1"].shape[0]
    c_out = 2 * cb
    itemsize = jnp.dtype(x_cm.dtype).itemsize

    if stride > 1:
        assert l % 2 == 0, "stride=2 path requires even length"
        lh = l // 2
        # Even/odd temporal phases (one XLA gather; see TODO about in-kernel
        # lane-strided loads).  Free metadata reshape, then two strided slices.
        x3 = x_cm.reshape(c_in, n * lh, 2)
        xe = x3[:, :, 0]
        xo = x3[:, :, 1]

        bpl = 4 * (4 * c_in + 2 * c_out + 3 * c_in + 6 * cb)
        bb = _pick_batch_block(n, lh, bpl)
        nb = n // bb

        # Row-interleaved final 1x1 weights + interleaved BN scale/bias:
        # even output rows <- branch1, odd output rows <- branch2.
        w1_i = _interleave_rows(params["b1_w1"], jnp.zeros_like(params["b1_w1"]))
        w2_i = _interleave_rows(jnp.zeros_like(params["b2_w2"]), params["b2_w2"])
        s_i = _interleave_cols(params["b1_s2"], params["b2_s3"])
        b_i = _interleave_cols(params["b1_b2"], params["b2_b3"])

        b1_wd = params["b1_wd"]
        b2_wd = params["b2_wd"]
        weights = [b1_wd[:, 0:1], b1_wd[:, 1:2], b1_wd[:, 2:3],
                   params["b1_s1"], params["b1_b1"],
                   params["b2_w1"], params["b2_s1"], params["b2_b1"],
                   b2_wd[:, 0:1], b2_wd[:, 1:2], b2_wd[:, 2:3],
                   params["b2_s2"], params["b2_b2"],
                   w1_i, w2_i, s_i, b_i]

        nh = n * lh
        flops = nh * (4 * cb * c_in + 4 * cb * c_in + 4 * cb * cb
                      + 10 * (c_in + cb))
        bytes_acc = (2 * c_in + c_out) * nh * itemsize

        in_specs = ([pl.BlockSpec((c_in, bb * lh), lambda i: (0, i))] * 2
                    + [_full_spec(w) for w in weights])
        out = pl.pallas_call(
            functools.partial(_shuffle_s2_kernel, lh),
            out_shape=jax.ShapeDtypeStruct((c_out, nh), x_cm.dtype),
            grid=(nb,),
            in_specs=in_specs,
            out_specs=pl.BlockSpec((c_out, bb * lh), lambda i: (0, i)),
            compiler_params=pltpu.CompilerParams(
                dimension_semantics=("parallel",),
                vmem_limit_bytes=_VMEM_LIMIT),
            cost_estimate=pl.CostEstimate(flops=int(flops), transcendentals=0,
                                          bytes_accessed=int(bytes_acc)),
        )(xe, xo, *weights)
        return out.reshape(c_out, n, lh)

    # ---------------- stride == 1 ----------------
    assert c_in == c_out, "stride=1 requires in_channels == out_channels"
    mid = c_in // 2
    xf = x_cm.reshape(c_in, n * l)

    bpl = 4 * (2 * c_in + 2 * c_out + 8 * cb)
    bb = _pick_batch_block(n, l, bpl)
    nb = n // bb

    # Even output rows: 0/1 permutation of the passthrough half (exact);
    # odd output rows: branch2's final 1x1.  Interleaved BN scale/bias.
    p_i = _interleave_rows(jnp.eye(cb, dtype=jnp.float32),
                           jnp.zeros((cb, cb), jnp.float32))
    w2_i = _interleave_rows(jnp.zeros_like(params["b2_w2"]), params["b2_w2"])
    s3_i = _interleave_cols(jnp.ones((cb, 1), jnp.float32), params["b2_s3"])
    b3_i = _interleave_cols(jnp.zeros((cb, 1), jnp.float32), params["b2_b3"])

    wd = params["b2_wd"]
    weights = [p_i, params["b2_w1"], params["b2_s1"], params["b2_b1"],
               wd[:, 0:1], wd[:, 1:2], wd[:, 2:3],
               params["b2_s2"], params["b2_b2"],
               w2_i, s3_i, b3_i]

    nl = n * l
    flops = nl * (2 * cb * cb + 4 * cb * cb + 4 * cb * cb + 14 * cb)
    bytes_acc = (c_in + c_out) * nl * itemsize

    in_specs = ([pl.BlockSpec((c_in, bb * l), lambda i: (0, i))]
                + [_full_spec(w) for w in weights])
    out = pl.pallas_call(
        functools.partial(_shuffle_s1_kernel, l, mid),
        out_shape=jax.ShapeDtypeStruct((c_out, nl), x_cm.dtype),
        grid=(nb,),
        in_specs=in_specs,
        out_specs=pl.BlockSpec((c_out, bb * l), lambda i: (0, i)),
        compiler_params=pltpu.CompilerParams(
            dimension_semantics=("parallel",),
            vmem_limit_bytes=_VMEM_LIMIT),
        cost_estimate=pl.CostEstimate(flops=int(flops), transcendentals=0,
                                      bytes_accessed=int(bytes_acc)),
    )(xf, *weights)
    return out.reshape(c_out, n, l)


# Channel-major inter-unit API (stack many units in this layout; no transposes).
shuffle_unit_forward_cm = jax.jit(_shuffle_unit_cm_impl,
                                  static_argnames=("stride",))


@functools.partial(jax.jit, static_argnames=("stride",))
def shuffle_unit_forward(x, params, stride):
    """NCL in / NCL out convenience wrapper (module-boundary layout only)."""
    x_cm = jnp.transpose(x, (1, 0, 2))                     # entry transpose
    out_cm = _shuffle_unit_cm_impl(x_cm, params, stride)
    return jnp.transpose(out_cm, (1, 0, 2))                # exit transpose


# --------------------------------------------------------------------------
# Parameters
# --------------------------------------------------------------------------
def _fold_bn(gamma, beta, mean, var, eps=1e-5):
    scale = gamma / jnp.sqrt(var + eps)
    bias = beta - mean * scale
    return (scale.reshape(-1, 1).astype(jnp.float32),
            bias.reshape(-1, 1).astype(jnp.float32))


def _bn_params(key, c):
    kg, kb = jax.random.split(key)
    gamma = jax.random.uniform(kg, (c,), jnp.float32, 0.5, 1.5)
    beta = 0.1 * jax.random.normal(kb, (c,), jnp.float32)
    mean = jnp.zeros((c,), jnp.float32)
    var = jnp.ones((c,), jnp.float32)
    return _fold_bn(gamma, beta, mean, var)


def init_shuffle_unit_params(key, in_channels, out_channels, stride):
    p = {}
    keys = jax.random.split(key, 16)
    if stride > 1:
        cb = out_channels // 2
        p["b1_wd"] = 0.2 * jax.random.normal(keys[0], (in_channels, 3), jnp.float32)
        p["b1_s1"], p["b1_b1"] = _bn_params(keys[1], in_channels)
        p["b1_w1"] = 0.2 * jax.random.normal(keys[2], (cb, in_channels), jnp.float32)
        p["b1_s2"], p["b1_b2"] = _bn_params(keys[3], cb)
        c2_in = in_channels
    else:
        assert in_channels == out_channels
        cb = out_channels // 2
        c2_in = in_channels // 2
    p["b2_w1"] = 0.2 * jax.random.normal(keys[8], (cb, c2_in), jnp.float32)
    p["b2_s1"], p["b2_b1"] = _bn_params(keys[9], cb)
    p["b2_wd"] = 0.2 * jax.random.normal(keys[10], (cb, 3), jnp.float32)
    p["b2_s2"], p["b2_b2"] = _bn_params(keys[11], cb)
    p["b2_w2"] = 0.2 * jax.random.normal(keys[12], (cb, cb), jnp.float32)
    p["b2_s3"], p["b2_b3"] = _bn_params(keys[13], cb)
    return p


# --------------------------------------------------------------------------
# Pure-JAX reference (mirrors the PyTorch module, eval-mode BN)
# --------------------------------------------------------------------------
def _ref_shuffle_unit(x, params, stride):
    hi = jax.lax.Precision.HIGHEST

    def bn(y, s, b):
        return y * s.reshape(1, -1, 1) + b.reshape(1, -1, 1)

    def pw(y, w):
        return jnp.einsum("oc,ncl->nol", w, y, precision=hi)

    def dw3(y, wd, st):
        length = y.shape[-1]
        yp = jnp.pad(y, ((0, 0), (0, 0), (1, 1)))
        out = (wd[:, 0].reshape(1, -1, 1) * yp[..., 0:length]
               + wd[:, 1].reshape(1, -1, 1) * yp[..., 1:length + 1]
               + wd[:, 2].reshape(1, -1, 1) * yp[..., 2:length + 2])
        return out[..., ::st]

    def branch2(y):
        y = jax.nn.relu(bn(pw(y, params["b2_w1"]), params["b2_s1"], params["b2_b1"]))
        y = bn(dw3(y, params["b2_wd"], stride), params["b2_s2"], params["b2_b2"])
        return jax.nn.relu(bn(pw(y, params["b2_w2"]), params["b2_s3"], params["b2_b3"]))

    if stride > 1:
        y1 = bn(dw3(x, params["b1_wd"], stride), params["b1_s1"], params["b1_b1"])
        y1 = jax.nn.relu(bn(pw(y1, params["b1_w1"]), params["b1_s2"], params["b1_b2"]))
        out = jnp.concatenate([y1, branch2(x)], axis=1)
    else:
        mid = x.shape[1] // 2
        out = jnp.concatenate([x[:, :mid], branch2(x[:, mid:])], axis=1)
    n, c, length = out.shape
    return out.reshape(n, 2, c // 2, length).transpose(0, 2, 1, 3).reshape(n, c, length)


# --------------------------------------------------------------------------
if __name__ == "__main__":
    key = jax.random.PRNGKey(0)
    kx1, kx2, kp1, kp2 = jax.random.split(key, 4)

    # stride = 1 config: in_channels == out_channels
    n, c, length = 2, 16, 32
    x_s1 = jax.random.normal(kx1, (n, c, length), jnp.float32)
    params_s1 = init_shuffle_unit_params(kp1, c, c, stride=1)
    out_s1 = jax.block_until_ready(shuffle_unit_forward(x_s1, params_s1, stride=1))
    assert out_s1.shape == (n, c, length), out_s1.shape
    ref_s1 = _ref_shuffle_unit(x_s1, params_s1, 1)
    err1 = float(jnp.max(jnp.abs(out_s1 - ref_s1)))
    assert jnp.allclose(out_s1, ref_s1, rtol=1e-2, atol=1e-2), err1

    # channel-major inter-unit API (no layout passes at all)
    out_cm = jax.block_until_ready(
        shuffle_unit_forward_cm(x_s1.transpose(1, 0, 2), params_s1, stride=1))
    assert out_cm.shape == (c, n, length), out_cm.shape
    assert jnp.allclose(out_cm.transpose(1, 0, 2), ref_s1, rtol=1e-2, atol=1e-2)

    # stride = 2 config: downsampling unit
    c_in2, c_out2 = 8, 16
    x_s2 = jax.random.normal(kx2, (n, c_in2, length), jnp.float32)
    params_s2 = init_shuffle_unit_params(kp2, c_in2, c_out2, stride=2)
    out_s2 = jax.block_until_ready(shuffle_unit_forward(x_s2, params_s2, stride=2))
    assert out_s2.shape == (n, c_out2, length // 2), out_s2.shape
    ref_s2 = _ref_shuffle_unit(x_s2, params_s2, 2)
    err2 = float(jnp.max(jnp.abs(out_s2 - ref_s2)))
    assert jnp.allclose(out_s2, ref_s2, rtol=1e-2, atol=1e-2), err2

    print("KERNEL_OK")
</pallas_src>

<mosaic_0001>
module attributes {stable_mosaic.version = 11 : i64} {
  func.func @_shuffle_s1_kernel(%arg0: i32, %arg1: memref<16x64xf32, #tpu.memory_space<vmem>>, %arg2: memref<16x8xf32, #tpu.memory_space<vmem>>, %arg3: memref<8x8xf32, #tpu.memory_space<vmem>>, %arg4: memref<8x1xf32, #tpu.memory_space<vmem>>, %arg5: memref<8x1xf32, #tpu.memory_space<vmem>>, %arg6: memref<8x1xf32, #tpu.memory_space<vmem>>, %arg7: memref<8x1xf32, #tpu.memory_space<vmem>>, %arg8: memref<8x1xf32, #tpu.memory_space<vmem>>, %arg9: memref<8x1xf32, #tpu.memory_space<vmem>>, %arg10: memref<8x1xf32, #tpu.memory_space<vmem>>, %arg11: memref<16x8xf32, #tpu.memory_space<vmem>>, %arg12: memref<16x1xf32, #tpu.memory_space<vmem>>, %arg13: memref<16x1xf32, #tpu.memory_space<vmem>>, %arg14: memref<16x64xf32, #tpu.memory_space<vmem>>) attributes {dimension_semantics = [#tpu.dimension_semantics<parallel>], iteration_bounds = array<i64: 1>, scalar_prefetch = 0 : i64, scratch_operands = 0 : i64, tpu.core_type = #tpu.core_type<tc>, window_params = [{transform_indices = @transform_0, window_bounds = array<i64: 16, 64>}, {pipeline_mode = #tpu.pipeline_mode<synchronous>, transform_indices = @transform_1, window_bounds = array<i64: 16, 8>}, {pipeline_mode = #tpu.pipeline_mode<synchronous>, transform_indices = @transform_2, window_bounds = array<i64: 8, 8>}, {pipeline_mode = #tpu.pipeline_mode<synchronous>, transform_indices = @transform_3, window_bounds = array<i64: 8, 1>}, {pipeline_mode = #tpu.pipeline_mode<synchronous>, transform_indices = @transform_4, window_bounds = array<i64: 8, 1>}, {pipeline_mode = #tpu.pipeline_mode<synchronous>, transform_indices = @transform_5, window_bounds = array<i64: 8, 1>}, {pipeline_mode = #tpu.pipeline_mode<synchronous>, transform_indices = @transform_6, window_bounds = array<i64: 8, 1>}, {pipeline_mode = #tpu.pipeline_mode<synchronous>, transform_indices = @transform_7, window_bounds = array<i64: 8, 1>}, {pipeline_mode = #tpu.pipeline_mode<synchronous>, transform_indices = @transform_8, window_bounds = array<i64: 8, 1>}, {pipeline_mode = #tpu.pipeline_mode<synchronous>, transform_indices = @transform_9, window_bounds = array<i64: 8, 1>}, {pipeline_mode = #tpu.pipeline_mode<synchronous>, transform_indices = @transform_10, window_bounds = array<i64: 16, 8>}, {pipeline_mode = #tpu.pipeline_mode<synchronous>, transform_indices = @transform_11, window_bounds = array<i64: 16, 1>}, {pipeline_mode = #tpu.pipeline_mode<synchronous>, transform_indices = @transform_12, window_bounds = array<i64: 16, 1>}, {transform_indices = @transform_13, window_bounds = array<i64: 16, 64>}]} {
    %0 = tpu.iota {dimensions = array<i32: 1>} : vector<1x64xi32>
    %c32_i32 = arith.constant 32 : i32
    %c0_i32 = arith.constant 0 : i32
    %1 = arith.cmpi eq, %c32_i32, %c0_i32 : i32
    %c1_i32 = arith.constant 1 : i32
    %2 = arith.select %1, %c1_i32, %c32_i32 : i32
    %3 = vector.broadcast %2 : i32 to vector<1x64xi32>
    %4 = arith.remsi %0, %3 : vector<1x64xi32>
    %c0_i32_0 = arith.constant 0 : i32
    %5 = vector.broadcast %c0_i32_0 : i32 to vector<1x64xi32>
    %6 = arith.cmpi ne, %4, %5 : vector<1x64xi32>
    %c0_i32_1 = arith.constant 0 : i32
    %7 = vector.broadcast %c0_i32_1 : i32 to vector<1x64xi32>
    %8 = arith.cmpi slt, %4, %7 : vector<1x64xi32>
    %c0_i32_2 = arith.constant 0 : i32
    %9 = arith.cmpi slt, %2, %c0_i32_2 : i32
    %10 = vector.broadcast %9 : i1 to vector<1x64xi1>
    %11 = vector.broadcast %10 : vector<1x64xi1> to vector<1x64xi1>
    %12 = arith.xori %8, %11 : vector<1x64xi1>
    %13 = arith.andi %12, %6 : vector<1x64xi1>
    %14 = vector.broadcast %2 : i32 to vector<1x64xi32>
    %15 = arith.addi %4, %14 : vector<1x64xi32>
    %16 = arith.select %13, %15, %4 : vector<1x64xi1>, vector<1x64xi32>
    %c0_i32_3 = arith.constant 0 : i32
    %17 = vector.broadcast %c0_i32_3 : i32 to vector<1x64xi32>
    %18 = arith.cmpi eq, %16, %17 : vector<1x64xi32>
    %c31_i32 = arith.constant 31 : i32
    %19 = vector.broadcast %c31_i32 : i32 to vector<1x64xi32>
    %20 = arith.cmpi eq, %16, %19 : vector<1x64xi32>
    %c0 = arith.constant 0 : index
    %c0_4 = arith.constant 0 : index
    %21 = vector.load %arg1[%c0, %c0_4] : memref<16x64xf32, #tpu.memory_space<vmem>>, vector<8x64xf32>
    %c0_5 = arith.constant 0 : index
    %c0_6 = arith.constant 0 : index
    %22 = vector.load %arg3[%c0_5, %c0_6] : memref<8x8xf32, #tpu.memory_space<vmem>>, vector<8x8xf32>
    %c8 = arith.constant 8 : index
    %c0_7 = arith.constant 0 : index
    %23 = vector.load %arg1[%c8, %c0_7] : memref<16x64xf32, #tpu.memory_space<vmem>>, vector<8x64xf32>
    %cst = arith.constant dense<0.000000e+00> : vector<8x64xf32>
    %24 = tpu.matmul %22, %23, %cst {dimension_numbers = #tpu.dot_dimension_numbers<[1], [0], [0], [1], [0, 0, 1, 1], [], []>} : vector<8x8xf32>, vector<8x64xf32>, vector<8x64xf32> -> vector<8x64xf32>
    %c0_8 = arith.constant 0 : index
    %c0_9 = arith.constant 0 : index
    %25 = vector.load %arg4[%c0_8, %c0_9] : memref<8x1xf32, #tpu.memory_space<vmem>>, vector<8x1xf32>
    %26 = vector.broadcast %25 : vector<8x1xf32> to vector<8x64xf32>
    %27 = arith.mulf %24, %26 : vector<8x64xf32>
    %c0_10 = arith.constant 0 : index
    %c0_11 = arith.constant 0 : index
    %28 = vector.load %arg5[%c0_10, %c0_11] : memref<8x1xf32, #tpu.memory_space<vmem>>, vector<8x1xf32>
    %29 = vector.broadcast %28 : vector<8x1xf32> to vector<8x64xf32>
    %30 = arith.addf %27, %29 : vector<8x64xf32>
    %cst_12 = arith.constant 0.000000e+00 : f32
    %31 = vector.broadcast %cst_12 : f32 to vector<8x64xf32>
    %32 = arith.maximumf %30, %31 : vector<8x64xf32>
    %c0_13 = arith.constant 0 : index
    %c0_14 = arith.constant 0 : index
    %33 = vector.load %arg6[%c0_13, %c0_14] : memref<8x1xf32, #tpu.memory_space<vmem>>, vector<8x1xf32>
    %c0_15 = arith.constant 0 : index
    %c0_16 = arith.constant 0 : index
    %34 = vector.load %arg7[%c0_15, %c0_16] : memref<8x1xf32, #tpu.memory_space<vmem>>, vector<8x1xf32>
    %c0_17 = arith.constant 0 : index
    %c0_18 = arith.constant 0 : index
    %35 = vector.load %arg8[%c0_17, %c0_18] : memref<8x1xf32, #tpu.memory_space<vmem>>, vector<8x1xf32>
    %c1_i32_19 = arith.constant 1 : i32
    %36 = tpu.dynamic_rotate %32 by %c1_i32_19 dim 1 : vector<8x64xf32>, i32 -> vector<8x64xf32>
    %cst_20 = arith.constant 0.000000e+00 : f32
    %37 = vector.shape_cast %18 : vector<1x64xi1> to vector<1x64xi1>
    %38 = vector.broadcast %37 : vector<1x64xi1> to vector<8x64xi1>
    %39 = vector.broadcast %cst_20 : f32 to vector<8x64xf32>
    %40 = arith.select %38, %39, %36 : vector<8x64xi1>, vector<8x64xf32>
    %c63_i32 = arith.constant 63 : i32
    %41 = tpu.dynamic_rotate %32 by %c63_i32 dim 1 : vector<8x64xf32>, i32 -> vector<8x64xf32>
    %cst_21 = arith.constant 0.000000e+00 : f32
    %42 = vector.shape_cast %20 : vector<1x64xi1> to vector<1x64xi1>
    %43 = vector.broadcast %42 : vector<1x64xi1> to vector<8x64xi1>
    %44 = vector.broadcast %cst_21 : f32 to vector<8x64xf32>
    %45 = arith.select %43, %44, %41 : vector<8x64xi1>, vector<8x64xf32>
    %46 = vector.broadcast %33 : vector<8x1xf32> to vector<8x64xf32>
    %47 = arith.mulf %46, %40 : vector<8x64xf32>
    %48 = vector.broadcast %34 : vector<8x1xf32> to vector<8x64xf32>
    %49 = arith.mulf %48, %32 : vector<8x64xf32>
    %50 = arith.addf %47, %49 : vector<8x64xf32>
    %51 = vector.broadcast %35 : vector<8x1xf32> to vector<8x64xf32>
    %52 = arith.mulf %51, %45 : vector<8x64xf32>
    %53 = arith.addf %50, %52 : vector<8x64xf32>
    %c0_22 = arith.constant 0 : index
    %c0_23 = arith.constant 0 : index
    %54 = vector.load %arg9[%c0_22, %c0_23] : memref<8x1xf32, #tpu.memory_space<vmem>>, vector<8x1xf32>
    %55 = vector.broadcast %54 : vector<8x1xf32> to vector<8x64xf32>
    %56 = arith.mulf %53, %55 : vector<8x64xf32>
    %c0_24 = arith.constant 0 : index
    %c0_25 = arith.constant 0 : index
    %57 = vector.load %arg10[%c0_24, %c0_25] : memref<8x1xf32, #tpu.memory_space<vmem>>, vector<8x1xf32>
    %58 = vector.broadcast %57 : vector<8x1xf32> to vector<8x64xf32>
    %59 = arith.addf %56, %58 : vector<8x64xf32>
    %c0_26 = arith.constant 0 : index
    %c0_27 = arith.constant 0 : index
    %60 = vector.load %arg11[%c0_26, %c0_27] : memref<16x8xf32, #tpu.memory_space<vmem>>, vector<16x8xf32>
    %cst_28 = arith.constant dense<0.000000e+00> : vector<16x64xf32>
    %61 = tpu.matmul %60, %59, %cst_28 {dimension_numbers = #tpu.dot_dimension_numbers<[1], [0], [0], [1], [0, 0, 1, 1], [], []>} : vector<16x8xf32>, vector<8x64xf32>, vector<16x64xf32> -> vector<16x64xf32>
    %c0_29 = arith.constant 0 : index
    %c0_30 = arith.constant 0 : index
    %62 = vector.load %arg12[%c0_29, %c0_30] : memref<16x1xf32, #tpu.memory_space<vmem>>, vector<16x1xf32>
    %63 = vector.broadcast %62 : vector<16x1xf32> to vector<16x64xf32>
    %64 = arith.mulf %61, %63 : vector<16x64xf32>
    %c0_31 = arith.constant 0 : index
    %c0_32 = arith.constant 0 : index
    %65 = vector.load %arg13[%c0_31, %c0_32] : memref<16x1xf32, #tpu.memory_space<vmem>>, vector<16x1xf32>
    %66 = vector.broadcast %65 : vector<16x1xf32> to vector<16x64xf32>
    %67 = arith.addf %64, %66 : vector<16x64xf32>
    %cst_33 = arith.constant 0.000000e+00 : f32
    %68 = vector.broadcast %cst_33 : f32 to vector<16x64xf32>
    %69 = arith.maximumf %67, %68 : vector<16x64xf32>
    %c0_34 = arith.constant 0 : index
    %c0_35 = arith.constant 0 : index
    %70 = vector.load %arg2[%c0_34, %c0_35] : memref<16x8xf32, #tpu.memory_space<vmem>>, vector<16x8xf32>
    %cst_36 = arith.constant dense<0.000000e+00> : vector<16x64xf32>
    %71 = tpu.matmul %70, %21, %cst_36 {dimension_numbers = #tpu.dot_dimension_numbers<[1], [0], [0], [1], [0, 0, 1, 1], [], []>} : vector<16x8xf32>, vector<8x64xf32>, vector<16x64xf32> -> vector<16x64xf32>
    %72 = arith.addf %71, %69 : vector<16x64xf32>
    %c0_37 = arith.constant 0 : index
    %c0_38 = arith.constant 0 : index
    %73 = vector.load %arg14[%c0_37, %c0_38] : memref<16x64xf32, #tpu.memory_space<vmem>>, vector<16x64xf32>
    tpu.vector_store %arg14[%c0_37, %c0_38], %72 {strides = array<i32>} : memref<16x64xf32, #tpu.memory_space<vmem>>, vector<16x64xf32>,
    return
  }
  func.func @transform_0(%arg0: i32) -> (i32, i32) {
    %c0_i32 = arith.constant 0 : i32
    %c0_i32_0 = arith.constant 0 : i32
    return %c0_i32, %arg0 : i32, i32
  }
  func.func @transform_1(%arg0: i32) -> (i32, i32) {
    %c0_i32 = arith.constant 0 : i32
    %c0_i32_0 = arith.constant 0 : i32
    %c0_i32_1 = arith.constant 0 : i32
    return %c0_i32, %c0_i32_0 : i32, i32
  }
  func.func @transform_2(%arg0: i32) -> (i32, i32) {
    %c0_i32 = arith.constant 0 : i32
    %c0_i32_0 = arith.constant 0 : i32
    %c0_i32_1 = arith.constant 0 : i32
    return %c0_i32, %c0_i32_0 : i32, i32
  }
  func.func @transform_3(%arg0: i32) -> (i32, i32) {
    %c0_i32 = arith.constant 0 : i32
    %c0_i32_0 = arith.constant 0 : i32
    %c0_i32_1 = arith.constant 0 : i32
    return %c0_i32, %c0_i32_0 : i32, i32
  }
  func.func @transform_4(%arg0: i32) -> (i32, i32) {
    %c0_i32 = arith.constant 0 : i32
    %c0_i32_0 = arith.constant 0 : i32
    %c0_i32_1 = arith.constant 0 : i32
    return %c0_i32, %c0_i32_0 : i32, i32
  }
  func.func @transform_5(%arg0: i32) -> (i32, i32) {
    %c0_i32 = arith.constant 0 : i32
    %c0_i32_0 = arith.constant 0 : i32
    %c0_i32_1 = arith.constant 0 : i32
    return %c0_i32, %c0_i32_0 : i32, i32
  }
  func.func @transform_6(%arg0: i32) -> (i32, i32) {
    %c0_i32 = arith.constant 0 : i32
    %c0_i32_0 = arith.constant 0 : i32
    %c0_i32_1 = arith.constant 0 : i32
    return %c0_i32, %c0_i32_0 : i32, i32
  }
  func.func @transform_7(%arg0: i32) -> (i32, i32) {
    %c0_i32 = arith.constant 0 : i32
    %c0_i32_0 = arith.constant 0 : i32
    %c0_i32_1 = arith.constant 0 : i32
    return %c0_i32, %c0_i32_0 : i32, i32
  }
  func.func @transform_8(%arg0: i32) -> (i32, i32) {
    %c0_i32 = arith.constant 0 : i32
    %c0_i32_0 = arith.constant 0 : i32
    %c0_i32_1 = arith.constant 0 : i32
    return %c0_i32, %c0_i32_0 : i32, i32
  }
  func.func @transform_9(%arg0: i32) -> (i32, i32) {
    %c0_i32 = arith.constant 0 : i32
    %c0_i32_0 = arith.constant 0 : i32
    %c0_i32_1 = arith.constant 0 : i32
    return %c0_i32, %c0_i32_0 : i32, i32
  }
  func.func @transform_10(%arg0: i32) -> (i32, i32) {
    %c0_i32 = arith.constant 0 : i32
    %c0_i32_0 = arith.constant 0 : i32
    %c0_i32_1 = arith.constant 0 : i32
    return %c0_i32, %c0_i32_0 : i32, i32
  }
  func.func @transform_11(%arg0: i32) -> (i32, i32) {
    %c0_i32 = arith.constant 0 : i32
    %c0_i32_0 = arith.constant 0 : i32
    %c0_i32_1 = arith.constant 0 : i32
    return %c0_i32, %c0_i32_0 : i32, i32
  }
  func.func @transform_12(%arg0: i32) -> (i32, i32) {
    %c0_i32 = arith.constant 0 : i32
    %c0_i32_0 = arith.constant 0 : i32
    %c0_i32_1 = arith.constant 0 : i32
    return %c0_i32, %c0_i32_0 : i32, i32
  }
  func.func @transform_13(%arg0: i32) -> (i32, i32) {
    %c0_i32 = arith.constant 0 : i32
    %c0_i32_0 = arith.constant 0 : i32
    return %c0_i32, %arg0 : i32, i32
  }
}

</mosaic_0001>

<bundles_post_ra>
// kernel: shuffle_unit_forward.1
= control target key start
LH: loop header
LB: loop body
LE: loop exit
PB: predicated region body
PF: predicated region fallthrough
CT: control target
= control target key end

     0   :  { %vm63_vm0 = vcmask 64512   ;;  %v448_v0 = vmov 0.0   ;;  %vm449_vm1 = vmmov 0   ;;  %v450_v4 = vmov 0   ;;  %s452_s24 = smov 65   ;;  %s453_s15 = smov 127   ;;  %s589_s0 = inlined_call_operand.vmem [shape: f32[16,64], index: 0, kind: input, shape index: {}]   ;;  %s590_s2 = inlined_call_operand.vmem [shape: f32[8,8], index: 2, kind: input, shape index: {}]   ;;  %s591_s3 = inlined_call_operand.vmem [shape: f32[8,1], index: 3, kind: input, shape index: {}]   ;;  %s592_s4 = inlined_call_operand.vmem [shape: f32[8,1], index: 4, kind: input, shape index: {}]   ;;  %s593_s5 = inlined_call_operand.vmem [shape: f32[8,1], index: 5, kind: input, shape index: {}]   ;;  %s594_s7 = inlined_call_operand.vmem [shape: f32[8,1], index: 7, kind: input, shape index: {}]   ;;  %s595_s8 = inlined_call_operand.vmem [shape: f32[8,1], index: 8, kind: input, shape index: {}]   ;;  %s596_s9 = inlined_call_operand.vmem [shape: f32[8,1], index: 9, kind: input, shape index: {}]   ;;  %s597_s11 = inlined_call_operand.vmem [shape: f32[16,1], index: 11, kind: input, shape index: {}]   ;;  %s598_s12 = inlined_call_operand.vmem [shape: f32[16,1], index: 12, kind: input, shape index: {}]   ;;  %s599_s6 = inlined_call_operand.vmem [shape: f32[8,1], index: 6, kind: input, shape index: {}]   ;;  %s600_s10 = inlined_call_operand.vmem [shape: f32[16,8], index: 10, kind: input, shape index: {}]   ;;  %s601_s1 = inlined_call_operand.vmem [shape: f32[16,8], index: 1, kind: input, shape index: {}]   ;;  %s602_s13 = inlined_call_operand.vmem [shape: f32[16,64], index: 13, kind: output, shape index: {}]  }
   0x1   :  { %425 = vmatprep.subr.mxu0 %v448_v0  ;;  %v62_v1 = vld [vmem:[%s589_s0 + $0x8] sm:$0xff]  ;;  %427 = vmatprep.mubr.msk.f32.mxu0 %vm449_vm1, %v448_v0  ;;  %v61_v2 = vld [vmem:[%s590_s2] sm:$0xff]  ;;  %vm155_vm2 = vcmask 1048064   ;;  %v44_v30 = vlaneseq  ;;  %vm405_vm5 = vcmask 523264  }
   0x2   :  { %v137_v3 = vld [vmem:[%s591_s3] sm:$0xff]  ;;  %426 = vmatpush3.msra.mxu0 %v62_v1  ;;  %446 = vset.pattern.permute.xlu0 %v450_v4  ;;  %v293_v10 = vld [vmem:[%s597_s11 + $0x8] sm:$0xff] }
   0x3   :  { %428 = vmatmul.mubr.msk.f32.vlgmr.msra.gmra.mrb[0].mxu0 %vm63_vm0, %v61_v2  ;;  %140 = vperm.xlu0 %446, %v137_v3   ;;  %v144_v5 = vld [vmem:[%s592_s4] sm:$0xff]  ;;  %v307_v11 = vld [vmem:[%s598_s12 + $0x8] sm:$0xff]  ;;  %v45_v31 = vand.u32 127, %v44_v30 }
   0x4   :  { %447 = vset.pattern.permute.xlu1 %v450_v4  ;;  %v152_v6 = vld [vmem:[%s593_s5] sm:$0xff]  ;;  %v323_v27 = vld [vmem:[%s601_s1 + $0x8] sm:$0xff] }
   0x5   :  { %v154_v7 = vld [vmem:[%s594_s7] sm:$0xff]  ;;  %s451_s7 = smov 64   ;;  %v50_v33 = vand.u32 31, %v45_v31  ;;  %v210_v49 = vld [vmem:[%s600_s10 + $0x8] sm:$0xff] }
   0x6   :  { %v195_v8 = vld [vmem:[%s595_s8] sm:$0xff] }
   0x7   :  { %147 = vperm.xlu0 %446, %v144_v5   ;;  %v202_v9 = vld [vmem:[%s596_s9] sm:$0xff]  ;;  %vm58_vm3 = vcmp.eq.s32.totalorder %v50_v33, 0  ;;  %vm59_vm4 = vcmp.eq.s32.totalorder %v50_v33, 31 }
   0x8   :  { %v153_v21 = vld [vmem:[%s599_s6] sm:$0xff] }
   0x9   :  { %v209_v24 = vld [vmem:[%s600_s10] sm:$0xff] }
   0xa   :  { %432 = vmatprep.mubr.msk.f32.mxu1 %vm63_vm0, %v209_v24  ;;  %v60_v25 = vld [vmem:[%s589_s0] sm:$0xff] }
   0xb   :  { %177 = vperm.xlu0 %446, %v152_v6   ;;  %435 = vmatprep.subr.mxu0 %v60_v25  ;;  %v322_v26 = vld [vmem:[%s601_s1] sm:$0xff] }
   0xc   :  { %436 = vmatpush3.msra.mxu0 %v60_v25  ;;  %v292_v28 = vld [vmem:[%s597_s11] sm:$0xff]  ;;  %437 = vmatprep.mubr.msk.f32.mxu0 %vm63_vm0, %v322_v26 }
   0xd   :  { %438 = vmatmul.mubr.msk.f32.vlgmr.msra.gmra.mrb[2].mxu0 %vm63_vm0, %v323_v27  ;;  %v306_v29 = vld [vmem:[%s598_s12] sm:$0xff] }
   0xf   :  { %190 = vperm.xlu0 %446, %v154_v7  }
  0x13   :  { %198 = vperm.xlu0 %446, %v195_v8  }
  0x17   :  { %205 = vperm.xlu0 %446, %v202_v9  }
  0x1b   :  { %301 = vperm.xlu0 %446, %v293_v10  }
  0x1f   :  { %315 = vperm.xlu0 %446, %v307_v11  }
  0x82   :  { %v141_v12 = vpop.permute.xlu0 %140 }
  0x86   :  { %v148_v16 = vpop.permute.xlu0 %147 }
  0x8a   :  { %v178_v32 = vpop.permute.xlu0 %177 }
  0x8e   :  { %v191_v35 = vpop.permute.xlu0 %190 }
  0x92   :  { %v199_v41 = vpop.permute.xlu0 %198 }
  0x96   :  { %v206_v47 = vpop.permute.xlu0 %205 }
  0x9a   :  { %v302_v52 = vpop.permute.xlu0 %301 }
  0x9e   :  { %v316_v57 = vpop.permute.xlu0 %315 }
  0xd6   :  { %v133_v13 = vpop.f32.mrb[0].mxu0 }
  0xd7   :  { %v143_v14 = vmul.f32 %v141_v12, %v133_v13  ;;  %v429_v15 = vpop.f32.mrb[1].mxu0 }
  0xd9   :  { %v150_v17 = vadd.f32 %v148_v16, %v143_v14 }
  0xdb   :  { %v151_v18 = vmax.f32 %v150_v17, 0.0 }
  0xdd   :  { %156 = vrot.lane.b32.xlu1 %v151_v18, %s451_s7 }
  0xe0   :  { %v439_v50 = vpop.f32.mrb[2].mxu0 }
  0xe1   :  { %v396_v51 = vpop.f32.mrb[3].mxu0 }
 0x14f   :  { %v157_v19 = vpop.permute.xlu1 %156 }
 0x150   :  { %v158_v20 = vsel %vm155_vm2, %v157_v19, %v151_v18 }
 0x151   :  { %159 = vrot.lane.b32.xlu1 %v158_v20, %s451_s7 }
 0x155   :  { %183 = vperm.xlu1 %447, %v153_v21  }
 0x1c3   :  { %v160_v22 = vpop.permute.xlu1 %159 }
 0x1c4   :  { %v161_v23 = vsel %vm155_vm2, %v160_v22, %v151_v18 }
 0x1c5   :  { %165 = vrot.lane.b32.xlu1 %v161_v23, %s452_s24 }
 0x1c9   :  { %171 = vrot.lane.b32.xlu1 %v161_v23, %s453_s15 }
 0x1cd   :  { %296 = vperm.xlu1 %447, %v292_v28  }
 0x1d1   :  { %310 = vperm.xlu1 %447, %v306_v29  }
 0x1d4   :  { %v184_v34 = vpop.permute.xlu1 %183 }
 0x1d5   :  { %v186_v39 = vmul.f32 %v184_v34, %v151_v18 }
 0x237   :  { %v166_v36 = vpop.permute.xlu1 %165 }
 0x238   :  { %v168_v37 = vsel %vm58_vm3, 0.0, %v166_v36 }
 0x239   :  { %v180_v38 = vmul.f32 %v178_v32, %v168_v37 }
 0x23b   :  { %v172_v40 = vpop.permute.xlu1 %171  ;;  %v187_v43 = vadd.f32 %v186_v39, %v180_v38 }
 0x23c   :  { %v174_v42 = vsel %vm59_vm4, 0.0, %v172_v40 }
 0x23d   :  { %v193_v44 = vmul.f32 %v191_v35, %v174_v42 }
 0x23f   :  { %v194_v45 = vadd.f32 %v193_v44, %v187_v43 }
 0x241   :  { %v201_v46 = vmul.f32 %v199_v41, %v194_v45 }
 0x243   :  { %v208_v48 = vadd.f32 %v206_v47, %v201_v46 }
 0x245   :  { %430 = vmatprep.subr.mxu1 %v208_v48 }
 0x246   :  { %431 = vmatpush3.msra.mxu1 %v208_v48 }
 0x247   :  { %433 = vmatmul.mubr.msk.f32.vlgmr.msra.gmra.mrb[0].mxu1 %vm63_vm0, %v210_v49 }
 0x24c   :  { %v297_v53 = vpop.permute.xlu1 %296 }
 0x250   :  { %v311_v59 = vpop.permute.xlu1 %310 }
 0x31a   :  { %v434_v54 = vpop.f32.mrb[0].mxu1 }
 0x31b   :  { %v305_v55 = vmul.f32 %v434_v54, %v302_v52  ;;  %v283_v56 = vpop.f32.mrb[1].mxu1 }
 0x31c   :  { %v304_v58 = vmul.f32 %v297_v53, %v283_v56 }
 0x31d   :  { %v319_v60 = vadd.f32 %v316_v57, %v305_v55 }
 0x31e   :  { %v318_v61 = vadd.f32 %v311_v59, %v304_v58 }
 0x31f   :  { %v321_v62 = vmax.f32 %v319_v60, 0.0 }
 0x320   :  { %v320_v63 = vmax.f32 %v318_v61, 0.0 }
 0x321   :  { %v402_v0 = vadd.f32 %v439_v50, %v321_v62 }
 0x322   :  { %v397_v1 = vadd.f32 %v396_v51, %v320_v63 }
 0x323   :  { %407 = vst.msk [vmem:[%s602_s13 + $0x8] sm:$0xff] %vm405_vm5, %v402_v0 }
 0x324   :  { %406 = vst.msk [vmem:[%s602_s13] sm:$0xff] %vm405_vm5, %v397_v1 }

</bundles_post_ra>
